<compile_context>
chip_gen: v7x
topology: tpu7x:2x2x1
jax: 0.10.0
libtpu: 0.0.40
codegen_flags: <defaults>
</compile_context>

<pallas_src>
import functools

import jax
import jax.numpy as jnp
from jax.experimental import pallas as pl
from jax.experimental.pallas import tpu as pltpu


def _split_sum_concat_kernel(x_ref, o_ref, *, s1, s2):
    x = x_ref[...]                           # (TILE_R, D) tile in VMEM
    first = x[:, :s1]                        # (TILE_R, s1)
    second = x[:, s1:s1 + s2]                # (TILE_R, s2)
    third = x[:, s1 + s2:s1 + s2 + s1]       # (TILE_R, s1)
    # Build the whole output tile in registers and do ONE full-width store.
    o_ref[...] = jnp.concatenate([first + third, second], axis=-1)


def _round_up(n, m):
    return ((n + m - 1) // m) * m


def _reference(x, s1, s2):
    return jnp.concatenate(
        [x[..., :s1] + x[..., s1 + s2:], x[..., s1:s1 + s2]], axis=-1)


def split_sum_concat(x, split_size1, split_size2, *,
                     max_tile_rows=1024,
                     vmem_budget_bytes=8 << 20,   # conservative: fits v5e 16MiB scoped default
                     force_pallas=False):
    """x: (..., D) with D = 2*split_size1 + split_size2 (so first/third match)."""
    s1, s2 = split_size1, split_size2
    *lead, d = x.shape
    assert d - (s1 + s2) == s1, "third part must match first part size for the add"
    d_out = s1 + s2

    rows = 1
    for n in lead:
        rows *= n

    itemsize = jnp.dtype(x.dtype).itemsize

    # Tiny inputs: launch/custom-call overhead dwarfs the data movement; let
    # XLA fuse the slice+add+concat instead (demo overrides with force_pallas).
    if not force_pallas and rows * d * itemsize < (1 << 20):
        return _reference(x, s1, s2)

    x2d = x.reshape(rows, d)

    # --- tile sizing -------------------------------------------------------
    # Sublane packing: 8 rows (f32), 16 (bf16), 32 (int8/fp8).
    sublane = max(8, 32 // itemsize)
    # Double-buffered input block + output block per row of the tile.
    bytes_per_row = 2 * (d + d_out) * itemsize
    tile_r = max(sublane, min(max_tile_rows, vmem_budget_bytes // max(bytes_per_row, 1)))
    tile_r = (tile_r // sublane) * sublane
    # Don't allocate a tile bigger than the (sublane-rounded) problem.
    tile_r = min(tile_r, _round_up(rows, sublane))

    grid = (pl.cdiv(rows, tile_r),)

    cost = pl.CostEstimate(
        flops=rows * s1,                # one add per element of the first part
        transcendentals=0,
        bytes_accessed=rows * (d + d_out) * itemsize,
    )

    out2d = pl.pallas_call(
        functools.partial(_split_sum_concat_kernel, s1=s1, s2=s2),
        out_shape=jax.ShapeDtypeStruct((rows, d_out), x.dtype),
        grid_spec=pltpu.PrefetchScalarGridSpec(
            num_scalar_prefetch=0,
            grid=grid,
            in_specs=[pl.BlockSpec((tile_r, d), lambda i: (i, 0))],
            out_specs=pl.BlockSpec((tile_r, d_out), lambda i: (i, 0)),
        ),
        compiler_params=pltpu.CompilerParams(
            dimension_semantics=("parallel",),
        ),
        cost_estimate=cost,
    )(x2d)

    return out2d.reshape(*lead, d_out)


if __name__ == "__main__":
    key = jax.random.PRNGKey(0)
    B, S = 2, 8
    split_size1, split_size2 = 12, 8
    D = 2 * split_size1 + split_size2          # 32

    x = jax.random.normal(key, (B, S, D), dtype=jnp.float32)

    # Force the Pallas path even at demo size so the kernel is exercised.
    out = split_sum_concat(x, split_size1, split_size2, force_pallas=True)
    out = jax.block_until_ready(out)

    ref = _reference(x, split_size1, split_size2)
    assert out.shape == (B, S, split_size1 + split_size2)
    assert jnp.allclose(out, ref, atol=1e-6, rtol=1e-6)

    # Also exercise the 2-D input path of the original module.
    x2 = jax.random.normal(key, (16, D), dtype=jnp.float32)
    out2 = jax.block_until_ready(
        split_sum_concat(x2, split_size1, split_size2, force_pallas=True))
    assert jnp.allclose(out2, _reference(x2, split_size1, split_size2),
                        atol=1e-6, rtol=1e-6)

    print("KERNEL_OK")
</pallas_src>

<mosaic_0001>
module attributes {stable_mosaic.version = 11 : i64} {
  func.func @_split_sum_concat_kernel(%arg0: i32, %arg1: memref<16x32xf32, #tpu.memory_space<vmem>>, %arg2: memref<16x20xf32, #tpu.memory_space<vmem>>) attributes {dimension_semantics = [#tpu.dimension_semantics<parallel>], iteration_bounds = array<i64: 1>, scalar_prefetch = 0 : i64, scratch_operands = 0 : i64, tpu.core_type = #tpu.core_type<tc>, window_params = [{transform_indices = @transform_0, window_bounds = array<i64: 16, 32>}, {transform_indices = @transform_1, window_bounds = array<i64: 16, 20>}]} {
    %c0 = arith.constant 0 : index
    %c0_0 = arith.constant 0 : index
    %0 = vector.load %arg1[%c0, %c0_0] : memref<16x32xf32, #tpu.memory_space<vmem>>, vector<16x32xf32>
    %1 = vector.extract_strided_slice %0 {offsets = [0, 0], sizes = [16, 12], strides = [1, 1]} : vector<16x32xf32> to vector<16x12xf32>
    %2 = vector.extract_strided_slice %0 {offsets = [0, 12], sizes = [16, 8], strides = [1, 1]} : vector<16x32xf32> to vector<16x8xf32>
    %3 = vector.extract_strided_slice %0 {offsets = [0, 20], sizes = [16, 12], strides = [1, 1]} : vector<16x32xf32> to vector<16x12xf32>
    %4 = arith.addf %1, %3 : vector<16x12xf32>
    %5 = tpu.concatenate %4, %2 in 1 : vector<16x12xf32>, vector<16x8xf32> -> vector<16x20xf32>
    %c0_1 = arith.constant 0 : index
    %c0_2 = arith.constant 0 : index
    %6 = vector.load %arg2[%c0_1, %c0_2] : memref<16x20xf32, #tpu.memory_space<vmem>>, vector<16x20xf32>
    tpu.vector_store %arg2[%c0_1, %c0_2], %5 {strides = array<i32>} : memref<16x20xf32, #tpu.memory_space<vmem>>, vector<16x20xf32>,
    return
  }
  func.func @transform_0(%arg0: i32) -> (i32, i32) {
    %c0_i32 = arith.constant 0 : i32
    %c0_i32_0 = arith.constant 0 : i32
    return %arg0, %c0_i32 : i32, i32
  }
  func.func @transform_1(%arg0: i32) -> (i32, i32) {
    %c0_i32 = arith.constant 0 : i32
    %c0_i32_0 = arith.constant 0 : i32
    return %arg0, %c0_i32 : i32, i32
  }
}

</mosaic_0001>

<bundles_post_ra>
// kernel: tpu_custom_call.1
= control target key start
LH: loop header
LB: loop body
LE: loop exit
PB: predicated region body
PF: predicated region fallthrough
CT: control target
= control target key end

     0   :  { %6 = vsyncpa [#allocation3], 0  ;;  %s156_s0 = inlined_call_operand.hbm [shape: f32[16,32], index: 0, kind: input, shape index: {}]   ;;  %s157_s1 = inlined_call_operand.hbm [shape: f32[16,20], index: 1, kind: output, shape index: {}]  }
   0x1   :  { %7 = vsyncpa [#allocation4], 0  ;;  %s111_s6 = smov [#allocation2]   ;;  %s63_s10 = scalar_lea.hbm %s156_s0, 256 }
   0x2   :  { %s13_s7 = sshll.u32 %s111_s6, 4  ;;  %p64_p0 = scmp.ne.s32.totalorder %s156_s0, %s63_s10  ;;  %s14_s7 = int_to_ptr.vmem [resolvable:$true] %s13_s7 }
   0x3   :  { %p67_p1 = scmp.lt.u32.totalorder %s63_s10, %s156_s0 }
   0x5   :  { %p69_p2 = pnand %p67_p1, %p64_p0 }
   0x7   :  { %72 = shalt.err (!%p69_p2)
}
   0x8   :  { %s73_s15 = scalar_lea.vmem %s14_s7, 256  ;;  %p78_p4 = scmp.lt.s32.totalorder %s14_s7, %s14_s7 }
   0x9   :  { %p74_p3 = scmp.ne.s32.totalorder %s14_s7, %s73_s15  ;;  %p79_p5 = scmp.lt.s32.totalorder %s73_s15, %s73_s15 }
   0xb   :  { %p80_p6 = por %p79_p5, %p78_p4 }
   0xd   :  { %p81_p7 = pnand %p80_p6, %p74_p3 }
   0xf   :  { %84 = shalt.err (!%p81_p7)
}
  0x10   :  { %s112_s16 = smov 128   ;;  %s113_s17 = smov 8  }
  0x11   :  { %19 = dma.hbm_to_vmem [thread:$0]  %s156_s0, 256, %s14_s7, [#allocation3], %s112_s16, %s112_s16, %s113_s17  }
  0x12   :  { %107 = dma.done.wait [#allocation3], 256  }
  0x13   :  { %108 = vsyncadd [#allocation3], 4294967040  ;;  %v23_v0 = vld [vmem:[#allocation2] sm:$0xff]  ;;  %s114_s20 = smov 108   ;;  %v24_v1 = vld [vmem:[#allocation2 + $0x8] sm:$0xff]  ;;  %vm35_vm0 = vcmask 97280  }
  0x14   :  { %27 = vrot.lane.b32.xlu0 %v23_v0, %s114_s20  ;;  %vm38_vm1 = vcmask 162816   ;;  %s115_s21 = smov [#allocation5]  }
  0x15   :  { %s46_s22 = sshll.u32 %s115_s21, 4  ;;  %s47_s22 = int_to_ptr.vmem [resolvable:$true] %s46_s22 }
  0x16   :  { %s85_s0 = scalar_lea.vmem %s47_s22, 256  ;;  %p90_p9 = scmp.lt.s32.totalorder %s47_s22, %s47_s22 }
  0x17   :  { %p86_p8 = scmp.ne.s32.totalorder %s47_s22, %s85_s0  ;;  %p91_p10 = scmp.lt.s32.totalorder %s85_s0, %s85_s0 }
  0x18   :  { %29 = vrot.lane.b32.xlu0 %v24_v1, %s114_s20 }
  0x19   :  { %p92_p11 = por %p91_p10, %p90_p9 }
  0x1b   :  { %p93_p12 = pnand %p92_p11, %p86_p8 }
  0x86   :  { %v28_v2 = vpop.permute.xlu0 %27 }
  0x87   :  { %v33_v3 = vadd.f32 %v28_v2, %v23_v0 }
  0x89   :  { %v36_v4 = vsel %vm35_vm0, %v33_v3, %v23_v0 }
  0x8a   :  { %v30_v5 = vpop.permute.xlu0 %29  ;;  %39 = vst.msk [vmem:[#allocation5] sm:$0xff] %vm38_vm1, %v36_v4 }
  0x8b   :  { %v34_v6 = vadd.f32 %v30_v5, %v24_v1 }
  0x8d   :  { %v37_v7 = vsel %vm35_vm0, %v34_v6, %v24_v1 }
  0x8e   :  { %40 = vst.msk [vmem:[#allocation5 + $0x8] sm:$0xff] %vm38_vm1, %v37_v7 }
  0x8f   :  { %96 = shalt.err (!%p93_p12)
}
  0x90   :  { %s97_s25 = scalar_lea.hbm %s157_s1, 256 }
  0x91   :  { %p98_p13 = scmp.ne.s32.totalorder %s157_s1, %s97_s25  ;;  %p101_p0 = scmp.lt.u32.totalorder %s97_s25, %s157_s1 }
  0x93   :  { %p103_p1 = pnand %p101_p0, %p98_p13 }
  0x95   :  { %106 = shalt.err (!%p103_p1)
}
  0x96   :  { %52 = dma.vmem_to_hbm [thread:$0]  %s47_s22, 256, %s157_s1, [#allocation4], %s112_s16, %s112_s16, %s113_s17  }
  0x97   :  { %109 = dma.done.wait [#allocation4], 256  }
  0x98   :  { %110 = vsyncadd [#allocation4], 4294967040 }
  0x99   :  { %56 = vsyncpa [#allocation3], 1 }
  0x9a   :  { %57 = vsyncpa [#allocation4], 1 }

</bundles_post_ra>
